<compile_context>
chip_gen: v6e
topology: v6e:2x2x1
jax: 0.10.0
libtpu: 0.0.40
codegen_flags: <defaults>
</compile_context>

<pallas_src>
import jax
import jax.numpy as jnp
from jax.experimental import pallas as pl
from jax.experimental.pallas import tpu as pltpu

# --- small, TPU-friendly synthetic sizes ----------------------------------
B = 16              # batch (multiple of TB)
TB = 8              # batch tile per grid step (f32 sublane count)
N = 8               # clusters per sample
D = 32              # cluster feature dim
D_INT = 32          # intention embedding dim
HIDDEN = 64         # real MLP hidden dim
NUM_MODES = 3
HORIZON = 8
OUT_DIM = NUM_MODES * HORIZON * 2   # 48 real output columns

LANES = 128                          # lane-dense padding target
HIDDEN_PAD = 128                     # hidden padded to full vreg lanes
OUT_PAD = 128                        # output padded to full vreg lanes
W_ROWS = (D + D_INT) + HIDDEN_PAD    # 192 rows in the packed weight buffer (bf16)


def trajectory_decoder_kernel(feat_ref, mask_ref, intent_ref, w_ref, b_ref, out_ref):
    # feat_ref  : [TB, N, D]    f32
    # mask_ref  : [TB, N]       f32
    # intent_ref: [TB, D_INT]   f32
    # w_ref     : [192, 128]    bf16  (rows 0:D -> W1_feat, D:D+D_INT -> W1_int,
    #                                  D+D_INT: -> W2; cols zero-padded to 128)
    # b_ref     : [2, 128]      f32   (row 0 -> b1, row 1 -> b2; cols zero-padded)
    # out_ref   : [TB, 128]     f32   (lane-dense padded output)
    feat = feat_ref[...]
    mask = mask_ref[...]
    intent = intent_ref[...]

    # masked mean-pool over clusters (f32 VPU math; reduce on XLU, recip on EUP)
    m = mask[:, :, None]                                             # [TB, N, 1]
    denom = jnp.maximum(jnp.sum(mask, axis=1, keepdims=True), 1.0)   # [TB, 1]
    inv = pl.reciprocal(denom, approx=True)
    ctx = jnp.sum(feat * m, axis=1) * inv                            # [TB, D] f32

    # static, sublane-aligned views into the packed bf16 weight buffer (zero-cost)
    w1f = w_ref[0:D, :]                      # [D, 128]
    w1i = w_ref[D:D + D_INT, :]              # [D_INT, 128]
    w2 = w_ref[D + D_INT:W_ROWS, :]          # [128, 128]
    b1 = b_ref[0:1, :]                       # [1, 128] f32
    b2 = b_ref[1:2, :]                       # [1, 128] f32

    # "concat([ctx, intent]) @ W1" expressed as two bf16 MXU matmuls, f32 accumulate
    h = jnp.dot(ctx.astype(jnp.bfloat16), w1f, preferred_element_type=jnp.float32)
    h = h + jnp.dot(intent.astype(jnp.bfloat16), w1i,
                    preferred_element_type=jnp.float32)
    h = jnp.maximum(h + b1, 0.0)                                     # ReLU, [TB, 128]

    # trajectory regression head (padded columns of w2/b2 are zero)
    y = jnp.dot(h.astype(jnp.bfloat16), w2, preferred_element_type=jnp.float32) + b2
    out_ref[...] = y                                                 # lane-dense store


def trajectory_decoder(cluster_feature, cluster_mask, intention, w_packed, b_packed):
    """Batch-gridded pallas_call; weights/biases VMEM-resident via constant index_maps."""
    bsz = cluster_feature.shape[0]
    grid = (bsz // TB,)
    out_padded = pl.pallas_call(
        trajectory_decoder_kernel,
        out_shape=jax.ShapeDtypeStruct((bsz, OUT_PAD), jnp.float32),
        grid_spec=pltpu.PrefetchScalarGridSpec(
            num_scalar_prefetch=0,
            grid=grid,
            in_specs=[
                pl.BlockSpec((TB, N, D), lambda i: (i, 0, 0)),
                pl.BlockSpec((TB, N), lambda i: (i, 0)),
                pl.BlockSpec((TB, D_INT), lambda i: (i, 0)),
                pl.BlockSpec((W_ROWS, LANES), lambda i: (0, 0)),   # resident weights
                pl.BlockSpec((2, LANES), lambda i: (0, 0)),        # resident biases
            ],
            out_specs=pl.BlockSpec((TB, OUT_PAD), lambda i: (i, 0)),
        ),
        compiler_params=pltpu.CompilerParams(
            dimension_semantics=("parallel",)),   # batch sharding across v7x's 2 TCs
    )(cluster_feature, cluster_mask, intention, w_packed, b_packed)
    # lane-padding sliced off + reshape kept in JAX (layout plumbing, not compute)
    return out_padded[:, :OUT_DIM].reshape(bsz, NUM_MODES, HORIZON, 2)


def init_params(key):
    """Deterministic synthetic parameters (unpadded, f32)."""
    k1, k2 = jax.random.split(key, 2)
    w1 = jax.random.normal(k1, (D + D_INT, HIDDEN), jnp.float32) * 0.05
    b1 = jnp.zeros((HIDDEN,), jnp.float32)
    w2 = jax.random.normal(k2, (HIDDEN, OUT_DIM), jnp.float32) * 0.05
    b2 = jnp.zeros((OUT_DIM,), jnp.float32)
    return w1, b1, w2, b2


def pack_params(w1, b1, w2, b2):
    """Zero-pad to 128 lanes and pack into one bf16 weight buffer + one f32 bias buffer."""
    w1p = jnp.zeros((D + D_INT, LANES), jnp.float32).at[:, :HIDDEN].set(w1)
    w2p = jnp.zeros((HIDDEN_PAD, LANES), jnp.float32).at[:HIDDEN, :OUT_DIM].set(w2)
    w_packed = jnp.concatenate([w1p, w2p], axis=0).astype(jnp.bfloat16)   # [192, 128]
    b1p = jnp.zeros((LANES,), jnp.float32).at[:HIDDEN].set(b1)
    b2p = jnp.zeros((LANES,), jnp.float32).at[:OUT_DIM].set(b2)
    b_packed = jnp.stack([b1p, b2p], axis=0)                              # [2, 128]
    return w_packed, b_packed


def reference(feat, mask, intent, w1, b1, w2, b2):
    """Pure-JAX f32 reference for the same forward pass."""
    m = mask[:, :, None]
    denom = jnp.maximum(mask.sum(axis=1, keepdims=True), 1.0)
    ctx = (feat * m).sum(axis=1) / denom
    fused = jnp.concatenate([ctx, intent], axis=-1)
    h = jnp.maximum(fused @ w1 + b1, 0.0)
    y = h @ w2 + b2
    return y.reshape(feat.shape[0], NUM_MODES, HORIZON, 2)


if __name__ == "__main__":
    key = jax.random.PRNGKey(0)
    k_feat, k_int, k_param = jax.random.split(key, 3)

    cluster_feature = jax.random.normal(k_feat, (B, N, D), jnp.float32)
    # deterministic ragged validity pattern (simulates padded clusters)
    lengths = 1 + (jnp.arange(B) % N)                                 # [B], 1..N
    cluster_mask = (jnp.arange(N)[None, :] < lengths[:, None]).astype(jnp.float32)
    intention = jax.random.normal(k_int, (B, D_INT), jnp.float32)

    w1, b1, w2, b2 = init_params(k_param)
    w_packed, b_packed = pack_params(w1, b1, w2, b2)

    traj = trajectory_decoder(cluster_feature, cluster_mask, intention,
                              w_packed, b_packed)
    traj = jax.block_until_ready(traj)

    ref = reference(cluster_feature, cluster_mask, intention, w1, b1, w2, b2)

    assert traj.shape == (B, NUM_MODES, HORIZON, 2)
    assert bool(jnp.all(jnp.isfinite(traj)))
    # bf16 MXU + approx reciprocal -> loose tolerance vs f32 reference
    assert bool(jnp.allclose(traj, ref, atol=5e-2, rtol=5e-2))
    print("KERNEL_OK")
</pallas_src>

<mosaic_0001>
module attributes {stable_mosaic.version = 11 : i64} {
  func.func @trajectory_decoder_kernel(%arg0: i32, %arg1: memref<8x8x32xf32, #tpu.memory_space<vmem>>, %arg2: memref<8x8xf32, #tpu.memory_space<vmem>>, %arg3: memref<8x32xf32, #tpu.memory_space<vmem>>, %arg4: memref<192x128xbf16, #tpu.memory_space<vmem>>, %arg5: memref<2x128xf32, #tpu.memory_space<vmem>>, %arg6: memref<8x128xf32, #tpu.memory_space<vmem>>) attributes {dimension_semantics = [#tpu.dimension_semantics<parallel>], iteration_bounds = array<i64: 2>, scalar_prefetch = 0 : i64, scratch_operands = 0 : i64, tpu.core_type = #tpu.core_type<tc>, window_params = [{transform_indices = @transform_0, window_bounds = array<i64: 8, 8, 32>}, {transform_indices = @transform_1, window_bounds = array<i64: 8, 8>}, {transform_indices = @transform_2, window_bounds = array<i64: 8, 32>}, {pipeline_mode = #tpu.pipeline_mode<synchronous>, transform_indices = @transform_3, window_bounds = array<i64: 192, 128>}, {pipeline_mode = #tpu.pipeline_mode<synchronous>, transform_indices = @transform_4, window_bounds = array<i64: 2, 128>}, {transform_indices = @transform_5, window_bounds = array<i64: 8, 128>}]} {
    %c0 = arith.constant 0 : index
    %c0_0 = arith.constant 0 : index
    %c0_1 = arith.constant 0 : index
    %0 = vector.load %arg1[%c0, %c0_0, %c0_1] : memref<8x8x32xf32, #tpu.memory_space<vmem>>, vector<8x8x32xf32>
    %c0_2 = arith.constant 0 : index
    %c0_3 = arith.constant 0 : index
    %1 = vector.load %arg2[%c0_2, %c0_3] : memref<8x8xf32, #tpu.memory_space<vmem>>, vector<8x8xf32>
    %c0_4 = arith.constant 0 : index
    %c0_5 = arith.constant 0 : index
    %2 = vector.load %arg3[%c0_4, %c0_5] : memref<8x32xf32, #tpu.memory_space<vmem>>, vector<8x32xf32>
    %3 = vector.shape_cast %1 : vector<8x8xf32> to vector<8x8x1xf32>
    %cst = arith.constant dense<0.000000e+00> : vector<8xf32>
    %4 = vector.multi_reduction <add>, %1, %cst [1] : vector<8x8xf32> to vector<8xf32>
    %5 = vector.shape_cast %4 : vector<8xf32> to vector<8x1xf32>
    %cst_6 = arith.constant 1.000000e+00 : f32
    %6 = vector.broadcast %cst_6 : f32 to vector<8x1xf32>
    %7 = arith.maximumf %5, %6 : vector<8x1xf32>
    %8 = tpu.reciprocal %7 {approx = true} : vector<8x1xf32> -> vector<8x1xf32>
    %9 = vector.broadcast %3 : vector<8x8x1xf32> to vector<8x8x32xf32>
    %10 = arith.mulf %0, %9 : vector<8x8x32xf32>
    %cst_7 = arith.constant dense<0.000000e+00> : vector<8x32xf32>
    %11 = vector.multi_reduction <add>, %10, %cst_7 [1] : vector<8x8x32xf32> to vector<8x32xf32>
    %12 = vector.broadcast %8 : vector<8x1xf32> to vector<8x32xf32>
    %13 = arith.mulf %11, %12 : vector<8x32xf32>
    %c0_8 = arith.constant 0 : index
    %c0_9 = arith.constant 0 : index
    %14 = vector.load %arg4[%c0_8, %c0_9] : memref<192x128xbf16, #tpu.memory_space<vmem>>, vector<32x128xbf16>
    %c32 = arith.constant 32 : index
    %c0_10 = arith.constant 0 : index
    %15 = vector.load %arg4[%c32, %c0_10] : memref<192x128xbf16, #tpu.memory_space<vmem>>, vector<32x128xbf16>
    %c64 = arith.constant 64 : index
    %c0_11 = arith.constant 0 : index
    %16 = vector.load %arg4[%c64, %c0_11] : memref<192x128xbf16, #tpu.memory_space<vmem>>, vector<128x128xbf16>
    %c0_12 = arith.constant 0 : index
    %c0_13 = arith.constant 0 : index
    %17 = vector.load %arg5[%c0_12, %c0_13] : memref<2x128xf32, #tpu.memory_space<vmem>>, vector<1x128xf32>
    %c1 = arith.constant 1 : index
    %c0_14 = arith.constant 0 : index
    %18 = vector.load %arg5[%c1, %c0_14] : memref<2x128xf32, #tpu.memory_space<vmem>>, vector<1x128xf32>
    %19 = arith.truncf %13 : vector<8x32xf32> to vector<8x32xbf16>
    %cst_15 = arith.constant dense<0.000000e+00> : vector<8x128xf32>
    %20 = tpu.matmul %19, %14, %cst_15 {dimension_numbers = #tpu.dot_dimension_numbers<[1], [0], [0], [1], [0, 0, 1, 1], [], []>} : vector<8x32xbf16>, vector<32x128xbf16>, vector<8x128xf32> -> vector<8x128xf32>
    %21 = arith.truncf %2 : vector<8x32xf32> to vector<8x32xbf16>
    %cst_16 = arith.constant dense<0.000000e+00> : vector<8x128xf32>
    %22 = tpu.matmul %21, %15, %cst_16 {dimension_numbers = #tpu.dot_dimension_numbers<[1], [0], [0], [1], [0, 0, 1, 1], [], []>} : vector<8x32xbf16>, vector<32x128xbf16>, vector<8x128xf32> -> vector<8x128xf32>
    %23 = arith.addf %20, %22 : vector<8x128xf32>
    %24 = vector.broadcast %17 : vector<1x128xf32> to vector<8x128xf32>
    %25 = arith.addf %23, %24 : vector<8x128xf32>
    %cst_17 = arith.constant 0.000000e+00 : f32
    %26 = vector.broadcast %cst_17 : f32 to vector<8x128xf32>
    %27 = arith.maximumf %25, %26 : vector<8x128xf32>
    %28 = arith.truncf %27 : vector<8x128xf32> to vector<8x128xbf16>
    %cst_18 = arith.constant dense<0.000000e+00> : vector<8x128xf32>
    %29 = tpu.matmul %28, %16, %cst_18 {dimension_numbers = #tpu.dot_dimension_numbers<[1], [0], [0], [1], [0, 0, 1, 1], [], []>} : vector<8x128xbf16>, vector<128x128xbf16>, vector<8x128xf32> -> vector<8x128xf32>
    %30 = vector.broadcast %18 : vector<1x128xf32> to vector<8x128xf32>
    %31 = arith.addf %29, %30 : vector<8x128xf32>
    %c0_19 = arith.constant 0 : index
    %c0_20 = arith.constant 0 : index
    %32 = vector.load %arg6[%c0_19, %c0_20] : memref<8x128xf32, #tpu.memory_space<vmem>>, vector<8x128xf32>
    tpu.vector_store %arg6[%c0_19, %c0_20], %31 {strides = array<i32>} : memref<8x128xf32, #tpu.memory_space<vmem>>, vector<8x128xf32>,
    return
  }
  func.func @transform_0(%arg0: i32) -> (i32, i32, i32) {
    %c0_i32 = arith.constant 0 : i32
    %c0_i32_0 = arith.constant 0 : i32
    %c0_i32_1 = arith.constant 0 : i32
    return %arg0, %c0_i32, %c0_i32_0 : i32, i32, i32
  }
  func.func @transform_1(%arg0: i32) -> (i32, i32) {
    %c0_i32 = arith.constant 0 : i32
    %c0_i32_0 = arith.constant 0 : i32
    return %arg0, %c0_i32 : i32, i32
  }
  func.func @transform_2(%arg0: i32) -> (i32, i32) {
    %c0_i32 = arith.constant 0 : i32
    %c0_i32_0 = arith.constant 0 : i32
    return %arg0, %c0_i32 : i32, i32
  }
  func.func @transform_3(%arg0: i32) -> (i32, i32) {
    %c0_i32 = arith.constant 0 : i32
    %c0_i32_0 = arith.constant 0 : i32
    %c0_i32_1 = arith.constant 0 : i32
    return %c0_i32, %c0_i32_0 : i32, i32
  }
  func.func @transform_4(%arg0: i32) -> (i32, i32) {
    %c0_i32 = arith.constant 0 : i32
    %c0_i32_0 = arith.constant 0 : i32
    %c0_i32_1 = arith.constant 0 : i32
    return %c0_i32, %c0_i32_0 : i32, i32
  }
  func.func @transform_5(%arg0: i32) -> (i32, i32) {
    %c0_i32 = arith.constant 0 : i32
    %c0_i32_0 = arith.constant 0 : i32
    return %arg0, %c0_i32 : i32, i32
  }
}

</mosaic_0001>

<bundles_post_ra>
// kernel: tpu_custom_call.1
= control target key start
LH: loop header
LB: loop body
LE: loop exit
PB: predicated region body
PF: predicated region fallthrough
CT: control target
= control target key end

     0   :  { %10 = vsyncpa [#allocation3], 0  ;;  %s1413_s0 = inlined_call_operand.hbm [shape: f32[16,8,32], index: 0, kind: input, shape index: {}]   ;;  %s1414_s1 = inlined_call_operand.vmem [shape: f32[16,8], index: 1, kind: input, shape index: {}]   ;;  %s1415_s2 = inlined_call_operand.vmem [shape: f32[16,32], index: 2, kind: input, shape index: {}]   ;;  %s1416_s3 = inlined_call_operand.hbm [shape: bf16[192,128], index: 3, kind: input, shape index: {}]   ;;  %s1417_s4 = inlined_call_operand.vmem [shape: f32[2,128], index: 4, kind: input, shape index: {}]   ;;  %s1418_s5 = inlined_call_operand.hbm [shape: f32[16,128], index: 5, kind: output, shape index: {}]  }
   0x1   :  { %12 = vsyncpa [#allocation3 + $0x1], 0 }
   0x2   :  { %13 = vsyncpa [#allocation6], 0 }
   0x3   :  { %14 = vsyncpa [#allocation4], 0 }
   0x4   :  { %16 = vsyncpa [#allocation4 + $0x1], 0  ;;  %s1181_s18 = smov 0   ;;  %s1183_s19 = smov 0  }
   0x5   :  { %s1185_s20 = smov 0   ;;  %s1187_s21 = smov 0  }
   0x6 LB: > { %s1202_s22 = sadd.s32 4294967295, %s1140_s21   ;;  %s856_s23 = sadd.s32 4294967294, %s1140_s21   ;;  %s1140_s21 = sphi %s1187_s21, %s1440_s21   ;;  %s1136_s20 = sphi %s1185_s20, %s1439_s20   ;;  %s1132_s19 = sphi %s1183_s19, %s1438_s19   ;;  %s1128_s18 = sphi %s1181_s18, %s1437_s18  }
   0x7   : > { %p42_p0 = scmp.ne.s32.totalorder %s1132_s19, %s1128_s18  ;;  %p1419_p1 = scmp.eq.s32.totalorder %s1202_s22, 0 }
   0x8   : > { %p166_p3 = scmp.eq.s32.totalorder %s856_s23, 1  ;;  %p857_p5 = scmp.ge.s32.totalorder %s1140_s21, 1 }
   0x9   : > { %p1211_p4 = por %p1419_p1, %p42_p0  ;;  %p173_p7 = scmp.lt.s32.totalorder %s1140_s21, 3 }
   0xa   : > { %p1216_p6 = por %p166_p3, %p42_p0  ;;  %s1142_s27 = smov [#allocation5]  }
   0xb   : > { %s1423_s24 = scalar_select %p1211_p4, 1, 0 }
   0xc   : > { %s1424_s25 = scalar_select %p1216_p6, 1, 0 }
   0xd   : > { %p1221_p8 = pnand %p857_p5, %p173_p7  ;;  %s185_s28 = sshll.u32 %s1142_s27, 4  ;;  %s186_s28 = int_to_ptr.vmem [resolvable:$true] %s185_s28 }
   0xe   : > { %s1235_s30 = sadd.s32 1, %s1140_s21   ;;  %s29_s6 = sadd.s32 1, %s1136_s20 }
   0xf   : > { %s1425_s26 = scalar_select %p1221_p8, 1, 0 }
  0x10   : > { %p949_p9 = pneg %p1221_p8  ;;  %s26_s7 = ssub.s32 %s1140_s21, %s1235_s30 }
  0x11   : > { %s1029_s8 = scalar_lea.vmem %s186_s28, 1536  ;;  %p1037_p5 = scmp.lt.s32.totalorder %s186_s28, %s186_s28 }
  0x12   : > { %p1230_p11 = pnand %p949_p9, %p1419_p1  ;;  %p1030_p13 = scmp.ne.s32.totalorder %s186_s28, %s1029_s8 }
  0x13   : > { %p1038_p7 = scmp.lt.s32.totalorder %s1029_s8, %s1029_s8 }
  0x14   : > { %p1020_p12 = pneg %p1230_p11 }
  0x15   : > { %p1039_p10 = por %p1038_p7, %p1037_p5 }
  0x16   : > { %p1032_p0 = pnand %p1030_p13, %p1020_p12 }
  0x18   : > { %p1033_p3 = pneg %p1032_p0 }
  0x1a   : > { %p1040_p2 = pnand %p1039_p10, %p1033_p3 }
  0x1c   : > { %1043 = shalt.err (!%p1040_p2)
}
  0x1d   : > { %s1143_s9 = smov 64   ;;  %s1144_s10 = smov 4  }
  0x1e   : > { %952 = dma.hbm_to_vmem [thread:$0]  (!%p1230_p11), %s1416_s3, 1536, %s186_s28, [#allocation6], %s1143_s9, %s1143_s9, %s1144_s10  }
  0x1f   : > { %p27_p9 = scmp.eq.s32.totalorder %s26_s7, 0  ;;  %p36_p12 = scmp.ne.s32.totalorder %s1136_s20, %s1132_s19 }
  0x20   : > { %p37_p10 = scmp.eq.s32.totalorder %s1140_s21, 0  ;;  %p962_p2 = scmp.lt.s32.totalorder %s1140_s21, 2 }
  0x21   : > { %s1252_s13 = scalar_select %p27_p9, %s1136_s20, %s29_s6  }
  0x22   : > { %p38_p13 = por %p37_p10, %p36_p12  ;;  %p1427_p0 = scmp.eq.s32.totalorder %s1202_s22, 1 }
  0x23   : > { %s202_s15 = sand.u32 1, %s1136_s20   ;;  %s889_s16 = sshll.u32 %s1140_s21, 10 }
  0x24   : > { %p1256_p3 = por %p1427_p0, %p36_p12  ;;  %s860_s17 = sshll.u32 %s202_s15, 6 }
  0x25   : > { %s1265_s29 = scalar_lea.hbm %s1413_s0, %s889_s16  ;;  %s206_s28 = scalar_lea.vmem [#allocation2], %s860_s17 }
  0x26   : > { %s1428_s14 = scalar_select %p1256_p3, 1, 0 }
  0x27   : > { %s213_s6 = sshll.u32 %s206_s28, 4  ;;  %p1267_p11 = pnand %p962_p2, %p38_p13  ;;  %s1271_s6 = int_to_ptr.vmem [resolvable:$true] %s213_s6 }
  0x28   : > { %s1273_s8 = scalar_lea.sflag [#allocation3], %s202_s15  ;;  %s1044_s9 = scalar_lea.hbm %s1265_s29, 1024 }
  0x29   : > { %p1045_p5 = scmp.ne.s32.totalorder %s1265_s29, %s1044_s9  ;;  %p1046_p7 = pneg %p1267_p11 }
  0x2a   : > { %s1049_s12 = scalar_lea.hbm %s1413_s0, 2048  ;;  %p1050_p10 = scmp.lt.s32.totalorder %s1265_s29, %s1413_s0 }
  0x2b   : > { %p1047_p9 = pnand %p1046_p7, %p1045_p5  ;;  %p1051_p2 = scmp.lt.s32.totalorder %s1049_s12, %s1044_s9 }
  0x2d   : > { %p1048_p12 = pneg %p1047_p9  ;;  %p1052_p13 = por %p1051_p2, %p1050_p10 }
  0x2f   : > { %p1053_p0 = pnand %p1052_p13, %p1048_p12 }
  0x31   : > { %1056 = shalt.err (!%p1053_p0)
}
  0x32   : > { %s1057_s15 = scalar_lea.vmem %s1271_s6, 1024  ;;  %s1145_s23 = smov [#allocation2]  }
  0x33   : > { %p1058_p1 = scmp.ne.s32.totalorder %s1271_s6, %s1057_s15  ;;  %s1062_s27 = sshll.u32 %s1145_s23, 4  ;;  %s1063_s27 = int_to_ptr.vmem [resolvable:$false] %s1062_s27 }
  0x34   : > { %s1064_s28 = scalar_lea.vmem %s1063_s27, 2048  ;;  %p1065_p9 = scmp.lt.s32.totalorder %s1271_s6, %s1063_s27 }
  0x35   : > { %p1060_p6 = pnand %p1058_p1, %p1046_p7  ;;  %p1066_p3 = scmp.lt.s32.totalorder %s1064_s28, %s1057_s15 }
  0x37   : > { %p1061_p5 = pneg %p1060_p6  ;;  %p1067_p4 = por %p1066_p3, %p1065_p9 }
  0x39   : > { %p1068_p8 = pnand %p1067_p4, %p1061_p5 }
  0x3b   : > { %1071 = shalt.err (!%p1068_p8)
}
  0x3c   : > { %s1146_s9 = smov 128   ;;  %s1147_s10 = smov 8  }
  0x3d   : > { %956 = dma.hbm_to_vmem [thread:$0]  (!%p1267_p11), %s1265_s29, 1024, %s1271_s6, %s1273_s8, %s1146_s9, %s1146_s9, %s1147_s10  }
  0x3e   : > { %p1430_p1 = scmp.ne.s32.totalorder %s1425_s26, 0 }
  0x3f   : > { %s1297_s11 = sand.u32 (!%p1430_p1), 1, %s1132_s19   ;;  %p1431_p4 = scmp.ne.s32.totalorder (!%p1430_p1), %s1423_s24, 0 }
  0x40   : > { %239 = sbr.rel (%p1430_p1) target bundleno = 665 (0x299), region = 40  ;;  %s864_s12 = sshll.u32 (!%p1430_p1), %s1297_s11, 6 }
  0x41   : > { %s242_s16 = scalar_lea.sflag (!%p1430_p1), [#allocation3], %s1297_s11  ;;  %s1301_s17 = scalar_lea.vmem (!%p1430_p1), [#allocation2], %s864_s12 }
  0x45   : > { %1115 = dma.done.wait (%p1431_p4), %s242_s16, 1024  }
  0x46   : > { %1117 = vsyncadd (%p1431_p4), %s242_s16, 4294966272  ;;  %p1432_p6 = scmp.eq.s32.totalorder %s1202_s22, 0 }
  0x48   : > { %1119 = dma.done.wait (%p1432_p6), [#allocation6], 1536   ;;  %p1433_p8 = pmov %p1432_p6 }
  0x49   : > { %p285_p3 = scmp.lt.s32.totalorder %s1202_s22, 1  ;;  %v304_v0 = vlaneseq  ;;  %vm360_vm0 = vcmask 64512   ;;  %v1004_v20 = vld [vmem:[#allocation5 + $0x18] sm:$0xff]   ;;  %v1148_v21 = vmov 0.0   ;;  %v1005_v22 = vld [vmem:[#allocation5 + $0x10] sm:$0xff]   ;;  %vm374_vm1 = vcmask 261120  }
  0x4a   : > { %1121 = vsyncadd (%p1433_p8), [#allocation6], 4294965760  ;;  %905 = vmatprep.subr.bf16.mxu1 %v1148_v21  ;;  %921 = vmatprep.subr.bf16.mxu0 %v1148_v21  ;;  %vm1149_vm2 = vmmov 0   ;;  %v1006_v25 = vld [vmem:[#allocation5 + $0x8] sm:$0xff]   ;;  %v1007_v26 = vld [vmem:[#allocation5] sm:$0xff]   ;;  %vm562_vm3 = vcmask 1041409  }
  0x4b   : > { %s1313_s26 = scalar_select %p285_p3, %s1202_s22, 1  ;;  %v305_v1 = vshrl.u32 %v304_v0, 7  ;;  %906 = vmatpush3.bf16.msra.mxu1 %v1004_v20  ;;  %909 = vmatprep.mubr.msk.bf16.mxu1 %vm1149_vm2, %v1148_v21  ;;  %v1008_v27 = vld [vmem:[#allocation5 + $0x58] sm:$0xff]   ;;  %v1009_v28 = vld [vmem:[#allocation5 + $0x50] sm:$0xff]   ;;  %v1010_v29 = vld [vmem:[#allocation5 + $0x48] sm:$0xff]   ;;  %vm565_vm4 = vcmask 1042434  }
  0x4c   : > { %907 = vmatprep.subr.bf16.mxu1 %v1148_v21  ;;  %937 = vmatprep.mubr.msk.bf16.mxu0 %vm1149_vm2, %v1148_v21  ;;  %v1011_v30 = vld [vmem:[#allocation5 + $0x40] sm:$0xff]   ;;  %v1012_v31 = vld [vmem:[#allocation5 + $0x38] sm:$0xff]   ;;  %v1013_v32 = vld [vmem:[#allocation5 + $0x30] sm:$0xff]   ;;  %vm568_vm5 = vcmask 1043459   ;;  %vm571_vm6 = vcmask 1044484   ;;  %vm574_vm7 = vcmask 1045509  }
  0x4d   : > { %s867_s29 = sshll.u32 %s1313_s26, 3  ;;  %v320_v2 = vsub.s32 2, %v305_v1  ;;  %v306_v3 = vsub.s32 0, %v305_v1  ;;  %v327_v8 = vsub.s32 3, %v305_v1  ;;  %v334_v10 = vsub.s32 4, %v305_v1  ;;  %922 = vmatpush3.bf16.msra.mxu0 %v1008_v27  ;;  %v296_v35 = vld [vmem:[%s1301_s17 + $0x10] sm:$0xff] }
  0x4e   : > { %s288_s7 = scalar_lea.vmem %s1414_s1, %s867_s29  ;;  %v341_v12 = vsub.s32 5, %v305_v1  ;;  %v348_v14 = vsub.s32 6, %v305_v1  ;;  %v313_v15 = vsub.s32 1, %v305_v1  ;;  %v355_v17 = vsub.s32 7, %v305_v1  ;;  %s292_s23 = scalar_lea.vmem %s1415_s2, %s867_s29  ;;  %923 = vmatprep.subr.bf16.mxu0 %v1148_v21  ;;  %v294_v36 = vld [vmem:[%s1301_s17] sm:$0xff]  ;;  %v297_v37 = vld [vmem:[%s1301_s17 + $0x18] sm:$0xff] }
  0x4f   : > { %v302_v4 = vld [vmem:[%s288_s7] sm:$0xff]  ;;  %908 = vmatpush3.bf16.msra.mxu1 %v1005_v22  ;;  %v299_v48 = vld [vmem:[%s1301_s17 + $0x28] sm:$0xff]  ;;  %v300_v56 = vld [vmem:[%s1301_s17 + $0x30] sm:$0xff]  ;;  %vm577_vm8 = vcmask 1046534   ;;  %vm580_vm9 = vcmask 1047559   ;;  %s866_s9 = sshll.u32 %s1297_s11, 3 }
  0x50   : > { %v361_v5 = vsel %vm360_vm0, %v302_v4, 0.0  ;;  %v321_v6 = vrot.slane %v302_v4, %v320_v2  ;;  %v307_v7 = vrot.slane %v302_v4, %v306_v3  ;;  %v328_v9 = vrot.slane %v302_v4, %v327_v8  ;;  %v303_v23 = vld [vmem:[%s292_s23] sm:$0xff]  ;;  %913 = vmatprep.subr.bf16.mxu1 %v1148_v21  ;;  %v301_v3 = vld [vmem:[%s1301_s17 + $0x38] sm:$0xff]  ;;  %s886_s16 = sshll.u32 %s1202_s22, 7  ;;  %s739_s7 = scalar_lea.sflag [#allocation4], %s1297_s11 }
  0x51   : > { %362 = vadd.xlane.f32.xlu0 %v361_v5  ;;  %v335_v11 = vrot.slane %v302_v4, %v334_v10  ;;  %v342_v13 = vrot.slane %v302_v4, %v341_v12  ;;  %v349_v16 = vrot.slane %v302_v4, %v348_v14  ;;  %v314_v18 = vrot.slane %v302_v4, %v313_v15  ;;  %v298_v42 = vld [vmem:[%s1301_s17 + $0x20] sm:$0xff]  ;;  %s1370_s6 = scalar_lea.hbm %s1418_s5, %s886_s16  ;;  %p1434_p7 = scmp.ne.s32.totalorder %s1428_s14, 0 }
  0x52   : > { %323 = vbcast.lane.b32.xlu1 %v321_v6, 256  ;;  %v356_v19 = vrot.slane %v302_v4, %v355_v17  ;;  %v489_v24 = vpack.c.bf16 %v303_v23, %v303_v23  ;;  %924 = vmatpush3.bf16.msra.mxu0 %v1009_v28  ;;  %s1150_s22 = smov [#allocation7]  }
  0x53   : > { %925 = vmatprep.subr.bf16.mxu0 %v1148_v21  ;;  %s1076_s15 = sshll.u32 %s1150_s22, 4  ;;  %s1077_s15 = int_to_ptr.vmem [resolvable:$false] %s1076_s15 }
  0x54   : > { %910 = vmatmul.mubr.msk.bf16.vlgmr.msra.gmra.mxu1 %vm374_vm1, %v489_v24  ;;  %s1078_s23 = scalar_lea.vmem %s1077_s15, 256 }
  0x55   : > { %917 = vmatprep.mubr.msk.bf16.mxu1 %vm1149_vm2, %v1148_v21  ;;  %914 = vmatpush3.bf16.msra.mxu1 %v1006_v25 }
  0x56   : > { %309 = vbcast.lane.b32.xlu1 %v307_v7, 256  ;;  %915 = vmatprep.subr.bf16.mxu1 %v1148_v21 }
  0x57   : > { %926 = vmatpush3.bf16.msra.mxu0 %v1010_v29 }
  0x58   : > { %927 = vmatprep.subr.bf16.mxu0 %v1148_v21 }
  0x59   : > { %916 = vmatpush3.bf16.msra.mxu1 %v1007_v26 }
  0x5a   : > { %330 = vbcast.lane.b32.xlu1 %v328_v9, 256  ;;  %v295_v9 = vld [vmem:[%s1301_s17 + $0x8] sm:$0xff]  ;;  %s283_s17 = scalar_lea.vmem [#allocation7], %s866_s9 }
  0x5b   : > { %928 = vmatpush3.bf16.msra.mxu0 %v1011_v30  ;;  %s752_s26 = sshll.u32 %s283_s17, 4  ;;  %s1372_s26 = int_to_ptr.vmem [resolvable:$true] %s752_s26 }
  0x5c   : > { %929 = vmatprep.subr.bf16.mxu0 %v1148_v21  ;;  %s1072_s8 = scalar_lea.vmem %s1372_s26, 128  ;;  %p1079_p2 = scmp.lt.s32.totalorder %s1372_s26, %s1077_s15 }
  0x5d   : > { %p1073_p11 = scmp.ne.s32.totalorder %s1372_s26, %s1072_s8  ;;  %p1080_p13 = scmp.lt.s32.totalorder %s1078_s23, %s1072_s8 }
  0x5e   : > { %337 = vbcast.lane.b32.xlu1 %v335_v11, 256 }
  0x5f   : > { %930 = vmatpush3.bf16.msra.mxu0 %v1012_v31  ;;  %p1074_p12 = pnand %p1073_p11, %p1434_p7  ;;  %p1081_p0 = por %p1080_p13, %p1079_p2 }
  0x60   : > { %931 = vmatprep.subr.bf16.mxu0 %v1148_v21 }
  0x61   : > { %p1075_p10 = pneg %p1074_p12 }
  0x62   : > { %344 = vbcast.lane.b32.xlu1 %v342_v13, 256 }
  0x63   : > { %932 = vmatpush3.bf16.msra.mxu0 %v1013_v32  ;;  %p1082_p5 = pnand %p1081_p0, %p1075_p10 }
  0x64   : > { %933 = vmatprep.subr.bf16.mxu0 %v1148_v21 }
  0x66   : > { %351 = vbcast.lane.b32.xlu1 %v349_v16, 256 }
  0x67   : > { %316 = vbcast.lane.b32.xlu0 %v314_v18, 256 }
  0x6a   : > { %358 = vbcast.lane.b32.xlu1 %v356_v19, 256 }
  0xc4   : > { %v324_v33 = vpop.permute.xlu1 %323 }
  0xc5   : > { %v368_v39 = vmul.f32 %v324_v33, %v296_v35 }
  0xc7   : > { %v389_v44 = vsel %vm374_vm1, %v368_v39, 0.0 }
  0xc8   : > { %v310_v34 = vpop.permute.xlu1 %309  ;;  %v390_v50 = vrot.slane %v389_v44, 4 }
  0xc9   : > { %v366_v40 = vmul.f32 %v310_v34, %v294_v36 }
  0xca   : > { %v391_v58 = vadd.f32 %v390_v50, %v389_v44 }
  0xcb   : > { %v375_v46 = vsel %vm374_vm1, %v366_v40, 0.0 }
  0xcc   : > { %v331_v38 = vpop.permute.xlu1 %330  ;;  %v376_v52 = vrot.slane %v375_v46, 4  ;;  %v392_v6 = vrot.slane %v391_v58, 2 }
  0xcd   : > { %v369_v41 = vmul.f32 %v331_v38, %v297_v37 }
  0xce   : > { %v377_v61 = vadd.f32 %v376_v52, %v375_v46  ;;  %v393_v19 = vadd.f32 %v392_v6, %v391_v58 }
  0xcf   : > { %v396_v47 = vsel %vm374_vm1, %v369_v41, 0.0 }
  0xd0   : > { %v338_v43 = vpop.permute.xlu1 %337  ;;  %v397_v53 = vrot.slane %v396_v47, 4  ;;  %v378_v10 = vrot.slane %v377_v61, 2  ;;  %v394_v32 = vrot.slane %v393_v19, 1 }
  0xd1   : > { %v370_v45 = vmul.f32 %v338_v43, %v298_v42 }
  0xd2   : > { %v398_v62 = vadd.f32 %v397_v53, %v396_v47  ;;  %v379_v22 = vadd.f32 %v378_v10, %v377_v61  ;;  %v395_v42 = vadd.f32 %v394_v32, %v393_v19 }
  0xd3   : > { %v403_v49 = vsel %vm374_vm1, %v370_v45, 0.0 }
  0xd4   : > { %v345_v51 = vpop.permute.xlu1 %344  ;;  %v404_v55 = vrot.slane %v403_v49, 4  ;;  %v399_v11 = vrot.slane %v398_v62, 2  ;;  %v380_v33 = vrot.slane %v379_v22, 1 }
  0xd5   : > { %v371_v54 = vmul.f32 %v345_v51, %v299_v48 }
  0xd6   : > { %v405_v0 = vadd.f32 %v404_v55, %v403_v49  ;;  %v400_v23 = vadd.f32 %v399_v11, %v398_v62  ;;  %v381_v43 = vadd.f32 %v380_v33, %v379_v22 }
  0xd7   : > { %v410_v57 = vsel %vm374_vm1, %v371_v54, 0.0 }
  0xd8   : > { %v411_v59 = vrot.slane %v410_v57, 4  ;;  %v352_v60 = vpop.permute.xlu1 %351  ;;  %v406_v13 = vrot.slane %v405_v0, 2  ;;  %v401_v34 = vrot.slane %v400_v23, 1 }
  0xd9   : > { %v372_v63 = vmul.f32 %v352_v60, %v300_v56 }
  0xda   : > { %v412_v1 = vadd.f32 %v411_v59, %v410_v57  ;;  %v363_v2 = vpop.xlane.xlu0 %362  ;;  %v407_v26 = vadd.f32 %v406_v13, %v405_v0  ;;  %v402_v44 = vadd.f32 %v401_v34, %v400_v23 }
  0xdb   : > { %v417_v4 = vsel %vm374_vm1, %v372_v63, 0.0  ;;  %v364_v5 = vmax.f32 %v363_v2, 1.0 }
  0xdc   : > { %v418_v7 = vrot.slane %v417_v4, 4  ;;  %v359_v8 = vpop.permute.xlu1 %358  ;;  %v413_v14 = vrot.slane %v412_v1, 2  ;;  %v408_v36 = vrot.slane %v407_v26, 1 }
  0xdd   : > { %1016 = vrcp.f32 %v364_v5  ;;  %v373_v12 = vmul.f32 %v359_v8, %v301_v3 }
  0xde   : > { %v419_v15 = vadd.f32 %v418_v7, %v417_v4  ;;  %v317_v16 = vpop.permute.xlu0 %316  ;;  %v414_v27 = vadd.f32 %v413_v14, %v412_v1  ;;  %v409_v47 = vadd.f32 %v408_v36, %v407_v26 }
  0xdf   : > { %v424_v17 = vsel %vm374_vm1, %v373_v12, 0.0  ;;  %v367_v18 = vmul.f32 %v317_v16, %v295_v9 }
  0xe0   : > { %v425_v20 = vrot.slane %v424_v17, 4  ;;  %v420_v24 = vrot.slane %v419_v15, 2  ;;  %v415_v37 = vrot.slane %v414_v27, 1 }
  0xe1   : > { %v382_v25 = vsel %vm374_vm1, %v367_v18, 0.0 }
  0xe2   : > { %v426_v28 = vadd.f32 %v425_v20, %v424_v17  ;;  %v383_v29 = vrot.slane %v382_v25, 4  ;;  %v421_v35 = vadd.f32 %v420_v24, %v419_v15  ;;  %v416_v48 = vadd.f32 %v415_v37, %v414_v27 }
  0xe4   : > { %v427_v30 = vrot.slane %v426_v28, 2  ;;  %v384_v31 = vadd.f32 %v383_v29, %v382_v25  ;;  %v422_v45 = vrot.slane %v421_v35, 1 }
  0xe6   : > { %v428_v38 = vadd.f32 %v427_v30, %v426_v28  ;;  %v385_v39 = vrot.slane %v384_v31, 2  ;;  %v423_v59 = vadd.f32 %v422_v45, %v421_v35 }
  0xe8   : > { %v429_v40 = vrot.slane %v428_v38, 1  ;;  %v386_v41 = vadd.f32 %v385_v39, %v384_v31 }
  0xea   : > { %v1017_v46 = vpop.eup %1016  ;;  %v430_v49 = vadd.f32 %v429_v40, %v428_v38  ;;  %v387_v50 = vrot.slane %v386_v41, 1  ;;  %v1014_v40 = vld [vmem:[#allocation5 + $0x28] sm:$0xff]  }
  0xeb   : > { %v438_v51 = vrot.slane %v1017_v46, 7  ;;  %v432_v52 = vrot.slane %v1017_v46, 1  ;;  %v433_v53 = vrot.slane %v1017_v46, 2  ;;  %v434_v54 = vrot.slane %v1017_v46, 3  ;;  %934 = vmatpush3.bf16.msra.mxu0 %v1014_v40 }
  0xec   : > { %v388_v55 = vadd.f32 %v387_v50, %v386_v41  ;;  %v447_v56 = vmul.f32 %v1017_v46, %v381_v43  ;;  %v435_v57 = vrot.slane %v1017_v46, 4  ;;  %v436_v58 = vrot.slane %v1017_v46, 5  ;;  %935 = vmatprep.subr.bf16.mxu0 %v1148_v21  ;;  %v1015_v41 = vld [vmem:[#allocation5 + $0x20] sm:$0xff]  }
  0xed   : > { %v449_v60 = vmul.f32 %v433_v53, %v395_v42  ;;  %v450_v61 = vmul.f32 %v434_v54, %v402_v44  ;;  %v437_v62 = vrot.slane %v1017_v46, 6  ;;  %v454_v63 = vmul.f32 %v438_v51, %v430_v49  ;;  %v875_v42 = vld [vmem:[%s1417_s4] ss:$0 sm:$0xff]  ;;  %v876_v21 = vld [vmem:[%s1417_s4 + $0x1] ss:$0 sm:$0xff] }
  0xee   : > { %v448_v0 = vmul.f32 %v432_v52, %v388_v55  ;;  %v451_v1 = vmul.f32 %v435_v57, %v409_v47  ;;  %v452_v2 = vmul.f32 %v436_v58, %v416_v48  ;;  %v481_v6 = vpack.c.bf16 %v447_v56, %v447_v56 }
  0xef   : > { %v483_v3 = vpack.c.bf16 %v449_v60, %v449_v60  ;;  %v484_v4 = vpack.c.bf16 %v450_v61, %v450_v61  ;;  %v453_v5 = vmul.f32 %v437_v62, %v423_v59  ;;  %v488_v12 = vpack.c.bf16 %v454_v63, %v454_v63  ;;  %936 = vmatpush3.bf16.msra.mxu0 %v1015_v41 }
  0xf0   : > { %v482_v7 = vpack.c.bf16 %v448_v0, %v448_v0  ;;  %v485_v8 = vpack.c.bf16 %v451_v1, %v451_v1  ;;  %v486_v9 = vpack.c.bf16 %v452_v2, %v452_v2  ;;  %v553_v16 = vunpack.c.l.b16 %v481_v6 }
  0xf1   : > { %v555_v10 = vunpack.c.l.b16 %v483_v3  ;;  %v487_v11 = vpack.c.bf16 %v453_v5, %v453_v5  ;;  %v556_v14 = vunpack.c.l.b16 %v484_v4  ;;  %v560_v22 = vunpack.c.l.b16 %v488_v12 }
  0xf2   : > { %v554_v13 = vunpack.c.l.b16 %v482_v7  ;;  %v557_v15 = vunpack.c.l.b16 %v485_v8  ;;  %v558_v18 = vunpack.c.l.b16 %v486_v9 }
  0xf3   : > { %v564_v19 = vrot.slane %v555_v10, 6  ;;  %v559_v20 = vunpack.c.l.b16 %v487_v11  ;;  %v567_v24 = vrot.slane %v556_v14, 5  ;;  %v579_v31 = vrot.slane %v560_v22, 1 }
  0xf4   : > { %v561_v17 = vrot.slane %v554_v13, 7  ;;  %v570_v26 = vrot.slane %v557_v15, 4  ;;  %v573_v28 = vrot.slane %v558_v18, 3 }
  0xf5   : > { %v576_v30 = vrot.slane %v559_v20, 2 }
  0xf6   : > { %v563_v23 = vsel %vm562_vm3, %v561_v17, %v553_v16 }
  0xf7   : > { %v566_v25 = vsel %vm565_vm4, %v564_v19, %v563_v23 }
  0xf8   : > { %v569_v27 = vsel %vm568_vm5, %v567_v24, %v566_v25 }
  0xf9   : > { %v572_v29 = vsel %vm571_vm6, %v570_v26, %v569_v27 }
  0xfa   : > { %v575_v32 = vsel %vm574_vm7, %v573_v28, %v572_v29 }
  0xfb   : > { %v578_v33 = vsel %vm577_vm8, %v576_v30, %v575_v32 }
  0xfc   : > { %v581_v34 = vsel %vm580_vm9, %v579_v31, %v578_v33 }
  0xfd   : > { %v582_v35 = vpack.c.b16 %v581_v34, %v581_v34 }
  0xff   : > { %918 = vmatmul.mubr.msk.bf16.vlgmr.msra.gmra.mxu1 %vm374_vm1, %v582_v35 }
 0x114   : > { %v539_v36 = vpop.f32.mrf.mxu1 }
 0x116   : > { %v911_v37 = vpop.f32.mrf.mxu1 }
 0x118   : > { %v542_v38 = vpop.f32.mrf.mxu1 }
 0x11a   : > { %v912_v39 = vpop.f32.mrf.mxu1 }
 0x1bf   : > { %v632_v43 = vpop.f32.mrf.mxu1 }
 0x1c0   : > { %v633_v44 = vadd.f32 %v632_v43, %v539_v36 }
 0x1c1   : > { %v919_v45 = vpop.f32.mrf.mxu1 }
 0x1c2   : > { %v642_v46 = vadd.f32 %v875_v42, %v633_v44 }
 0x1c3   : > { %v635_v47 = vpop.f32.mrf.mxu1 }
 0x1c4   : > { %v643_v48 = vmax.f32 %v642_v46, 0.0 }
 0x1c5   : > { %v920_v49 = vpop.f32.mrf.mxu1 }
 0x1c6   : > { %v644_v50 = vpack.c.bf16 %v643_v48, %v643_v48 }
 0x1c8   : > { %938 = vmatmul.mubr.bf16.vlgmr.msra.gmra.mxu0 %v644_v50 }
 0x288   : > { %v731_v51 = vpop.f32.mrf.mxu0 }
 0x289   : > { %v732_v52 = vadd.f32 %v876_v21, %v731_v51 }
 0x28a   : > { %v939_v53 = vpop.f32.mrf.mxu0 }
 0x28b   : > { %737 = vst [vmem:[%s283_s17] sm:$0xff] %v732_v52 }
 0x28c   : > { %v734_v54 = vpop.f32.mrf.mxu0 }
 0x28d   : > { %1085 = shalt.err (!%p1082_p5)
}
 0x28e   : > { %s1086_s27 = scalar_lea.hbm %s1370_s6, 128  ;;  %s1090_s9 = scalar_lea.hbm %s1418_s5, 256 }
 0x28f   : > { %p1087_p9 = scmp.ne.s32.totalorder %s1370_s6, %s1086_s27  ;;  %p1091_p6 = scmp.lt.s32.totalorder %s1370_s6, %s1418_s5 }
 0x290   : > { %p1092_p8 = scmp.lt.s32.totalorder %s1090_s9, %s1086_s27 }
 0x291   : > { %p1088_p1 = pnand %p1087_p9, %p1434_p7 }
 0x292   : > { %p1093_p3 = por %p1092_p8, %p1091_p6 }
 0x293   : > { %p1089_p4 = pneg %p1088_p1 }
 0x295   : > { %p1094_p11 = pnand %p1093_p3, %p1089_p4 }
 0x297   : > { %1097 = shalt.err (!%p1094_p11)
}
 0x298   : > { %947 = dma.vmem_to_hbm [thread:$0]  (%p1434_p7), %s1372_s26, 128, %s1370_s6, %s739_s7   ;;  %v940_v55 = vpop.f32.mrf.mxu0 }
 0x299 PF: > { %s764_s16 = sand.u32 1, %s1128_s18   ;;  %p1435_p12 = scmp.ne.s32.totalorder %s1424_s25, 0 }
 0x29a   : > { %p1436_p10 = scmp.ge.s32.totalorder %s1140_s21, 2  ;;  %s765_s17 = scalar_lea.sflag [#allocation4], %s764_s16 }
 0x29c   : > { %p958_p2 = pnand %p1436_p10, %p1435_p12 }
 0x29e   : > { %p959_p13 = pneg %p958_p2 }
 0x2a0   : > { %1123 = dma.done.wait (%p959_p13), %s765_s17, 128  }
 0x2a1   : > { %1125 = vsyncadd (%p959_p13), %s765_s17, 4294967168  ;;  %p19_p0 = scmp.ge.s32.totalorder %s1235_s30, 4   ;;  %s1437_s18 = smov %s1132_s19 }
 0x2a2   : > { %s1438_s19 = smov %s1136_s20  ;;  %s1439_s20 = smov %s1252_s13 }
 0x2a3   : > { %s1440_s21 = smov %s1235_s30  ;;  %21 = sbr.rel (!%p19_p0) target bundleno = 6 (0x6), region = 95 }
 0x2a8   :  { %770 = vsyncpa [#allocation3], 1 }
 0x2a9   :  { %772 = vsyncpa [#allocation3 + $0x1], 1 }
 0x2aa   :  { %773 = vsyncpa [#allocation6], 1 }
 0x2ab   :  { %774 = vsyncpa [#allocation4], 1 }
 0x2ac   :  { %776 = vsyncpa [#allocation4 + $0x1], 1 }

</bundles_post_ra>
